<compile_context>
chip_gen: v7x
topology: tpu7x:2x2x1
jax: 0.10.0
libtpu: 0.0.40
codegen_flags: <defaults>
</compile_context>

<pallas_src>
import functools

import jax
import jax.numpy as jnp
from jax.experimental import pallas as pl
from jax.experimental.pallas import tpu as pltpu


def _round_up(a, b):
    return (a + b - 1) // b * b


def _sublane_rows(dtype):
    # Rows per sublane pack: 8 for 32-bit, 16 for 16-bit, 32 for 8-bit dtypes.
    return max(8, 32 // jnp.dtype(dtype).itemsize)


def _vmem_capacity_bytes():
    # Trace-time hardware query; conservative fallback (v7x per-TC VMEM).
    try:
        return int(pltpu.get_tpu_info().vmem_capacity_bytes)
    except Exception:
        return 64 << 20


def residual_ln_kernel(x_ref, y_ref, g_ref, b_ref, o_ref, *, eps, features):
    # Residual add (dropout in eval mode is identity); f32 math throughout.
    z = x_ref[...].astype(jnp.float32) + y_ref[...].astype(jnp.float32)
    mean = jnp.mean(z, axis=-1, keepdims=True)                 # (TM, 1)
    d = z - mean
    # torch.Tensor.std defaults to the unbiased estimator (N - 1 divisor).
    var = jnp.sum(d * d, axis=-1, keepdims=True) * (1.0 / (features - 1))
    std = jnp.sqrt(var)
    # One reciprocal per row (EUP) instead of TMxF divides on the VPU.
    inv = pl.reciprocal(std + eps, approx=False)               # (TM, 1)
    o_ref[...] = (d * inv * g_ref[...] + b_ref[...]).astype(o_ref.dtype)


def residual_layernorm(x, sub_out, gamma, beta, *, eps=1e-6, max_tile_m=1024):
    """out = LayerNorm(x + sub_out); matches the PyTorch Residual module
    (eval-mode dropout).  x, sub_out: (B, S, F).  gamma, beta: (F,)."""
    B, S, F = x.shape
    N = B * S
    dtype = x.dtype
    itemsize = jnp.dtype(dtype).itemsize
    sub = _sublane_rows(dtype)

    # ---- VMEM-aware tile sizing -------------------------------------------
    cap = _vmem_capacity_bytes()
    # Leave headroom below physical VMEM; never exceed ~100 MiB even on
    # 128 MiB parts, never drop below the 32 MiB default scoped limit.
    vmem_limit = int(min(cap - (16 << 20), 100 << 20))
    vmem_limit = max(vmem_limit, 32 << 20)
    budget = int(vmem_limit * 0.8)   # margin for compiler-managed temporaries

    # Per-row VMEM cost: double-buffered x, y tiles + double-buffered output
    # tile + ~4 f32 compute intermediates (z, d, product, cast buffer).
    per_row = 4 * F * itemsize + 2 * F * itemsize + 4 * F * 4
    tile_m = budget // per_row
    tile_m = max(sub, (tile_m // sub) * sub)     # sublane-pack aligned
    tile_m = min(tile_m, max_tile_m)
    tile_m = min(tile_m, _round_up(N, sub))      # no bigger than needed
    # -----------------------------------------------------------------------

    x2d = x.reshape(N, F)
    y2d = sub_out.reshape(N, F)
    g2d = gamma.reshape(1, F).astype(jnp.float32)
    b2d = beta.reshape(1, F).astype(jnp.float32)

    kernel = functools.partial(residual_ln_kernel, eps=eps, features=F)

    out2d = pl.pallas_call(
        kernel,
        out_shape=jax.ShapeDtypeStruct((N, F), dtype),
        grid_spec=pltpu.PrefetchScalarGridSpec(
            num_scalar_prefetch=0,
            grid=(pl.cdiv(N, tile_m),),          # ragged last block is fine:
            in_specs=[                           # row-wise op, masked stores
                pl.BlockSpec((tile_m, F), lambda i: (i, 0)),   # x tile
                pl.BlockSpec((tile_m, F), lambda i: (i, 0)),   # sublayer(x)
                pl.BlockSpec((1, F), lambda i: (0, 0)),        # gamma
                pl.BlockSpec((1, F), lambda i: (0, 0)),        # beta
            ],
            out_specs=pl.BlockSpec((tile_m, F), lambda i: (i, 0)),
        ),
        compiler_params=pltpu.CompilerParams(
            dimension_semantics=("parallel",),
            vmem_limit_bytes=vmem_limit,
        ),
    )(x2d, y2d, g2d, b2d)

    return out2d.reshape(B, S, F)


def _reference(x, sub_out, gamma, beta, eps):
    z = x + sub_out
    mean = z.mean(-1, keepdims=True)
    std = jnp.std(z, axis=-1, keepdims=True, ddof=1)   # unbiased (torch)
    return gamma * (z - mean) / (std + eps) + beta


def _run_case(key, B, S, F, eps, **kw):
    kx, kw_, kb, kg, kbe = jax.random.split(key, 5)
    x = jax.random.normal(kx, (B, S, F), dtype=jnp.float32)

    # Stand-in sublayer (the PyTorch module takes an arbitrary callable);
    # evaluated in plain JAX outside the Pallas kernel.
    w = jax.random.normal(kw_, (F, F), dtype=jnp.float32) * 0.05
    bias = jax.random.normal(kb, (F,), dtype=jnp.float32) * 0.05
    sub_out = jnp.tanh(x @ w + bias)

    gamma = 1.0 + 0.1 * jax.random.normal(kg, (F,), dtype=jnp.float32)
    beta = 0.1 * jax.random.normal(kbe, (F,), dtype=jnp.float32)

    out = residual_layernorm(x, sub_out, gamma, beta, eps=eps, **kw)
    out = jax.block_until_ready(out)
    ref = _reference(x, sub_out, gamma, beta, eps)

    assert out.shape == (B, S, F)
    assert jnp.allclose(out, ref, atol=1e-5, rtol=1e-5), \
        f"mismatch vs reference for shape {(B, S, F)}"


if __name__ == "__main__":
    key = jax.random.PRNGKey(0)
    k1, k2 = jax.random.split(key)
    eps = 1e-6

    # Small shapes implied by the module: (batch, seq, features).
    _run_case(k1, B=2, S=8, F=32, eps=eps)

    # Non-divisible token count (N = 21) with a small forced tile (tile_m = 8,
    # grid = 3) to exercise the ragged last block / masked-store path.
    _run_case(k2, B=3, S=7, F=48, eps=eps, max_tile_m=8)

    print("KERNEL_OK")
</pallas_src>

<mosaic_0001>
module attributes {stable_mosaic.version = 11 : i64} {
  func.func @residual_ln_kernel(%arg0: i32, %arg1: memref<16x32xf32, #tpu.memory_space<vmem>>, %arg2: memref<16x32xf32, #tpu.memory_space<vmem>>, %arg3: memref<1x32xf32, #tpu.memory_space<vmem>>, %arg4: memref<1x32xf32, #tpu.memory_space<vmem>>, %arg5: memref<16x32xf32, #tpu.memory_space<vmem>>) attributes {dimension_semantics = [#tpu.dimension_semantics<parallel>], iteration_bounds = array<i64: 1>, scalar_prefetch = 0 : i64, scratch_operands = 0 : i64, tpu.core_type = #tpu.core_type<tc>, window_params = [{transform_indices = @transform_0, window_bounds = array<i64: 16, 32>}, {transform_indices = @transform_1, window_bounds = array<i64: 16, 32>}, {pipeline_mode = #tpu.pipeline_mode<synchronous>, transform_indices = @transform_2, window_bounds = array<i64: 1, 32>}, {pipeline_mode = #tpu.pipeline_mode<synchronous>, transform_indices = @transform_3, window_bounds = array<i64: 1, 32>}, {transform_indices = @transform_4, window_bounds = array<i64: 16, 32>}]} {
    %c0 = arith.constant 0 : index
    %c0_0 = arith.constant 0 : index
    %0 = vector.load %arg1[%c0, %c0_0] : memref<16x32xf32, #tpu.memory_space<vmem>>, vector<16x32xf32>
    %c0_1 = arith.constant 0 : index
    %c0_2 = arith.constant 0 : index
    %1 = vector.load %arg2[%c0_1, %c0_2] : memref<16x32xf32, #tpu.memory_space<vmem>>, vector<16x32xf32>
    %2 = arith.addf %0, %1 : vector<16x32xf32>
    %cst = arith.constant dense<0.000000e+00> : vector<16xf32>
    %3 = vector.multi_reduction <add>, %2, %cst [1] : vector<16x32xf32> to vector<16xf32>
    %4 = vector.shape_cast %3 : vector<16xf32> to vector<16x1xf32>
    %cst_3 = arith.constant 3.200000e+01 : f32
    %5 = vector.broadcast %cst_3 : f32 to vector<16x1xf32>
    %6 = arith.divf %4, %5 : vector<16x1xf32>
    %7 = vector.broadcast %6 : vector<16x1xf32> to vector<16x32xf32>
    %8 = arith.subf %2, %7 : vector<16x32xf32>
    %9 = arith.mulf %8, %8 : vector<16x32xf32>
    %cst_4 = arith.constant dense<0.000000e+00> : vector<16xf32>
    %10 = vector.multi_reduction <add>, %9, %cst_4 [1] : vector<16x32xf32> to vector<16xf32>
    %11 = vector.shape_cast %10 : vector<16xf32> to vector<16x1xf32>
    %cst_5 = arith.constant 0.0322580636 : f32
    %12 = vector.broadcast %cst_5 : f32 to vector<16x1xf32>
    %13 = arith.mulf %11, %12 : vector<16x1xf32>
    %14 = math.sqrt %13 : vector<16x1xf32>
    %cst_6 = arith.constant 9.99999997E-7 : f32
    %15 = vector.broadcast %cst_6 : f32 to vector<16x1xf32>
    %16 = arith.addf %14, %15 : vector<16x1xf32>
    %17 = tpu.reciprocal %16 : vector<16x1xf32> -> vector<16x1xf32>
    %18 = vector.broadcast %17 : vector<16x1xf32> to vector<16x32xf32>
    %19 = arith.mulf %8, %18 : vector<16x32xf32>
    %c0_7 = arith.constant 0 : index
    %c0_8 = arith.constant 0 : index
    %20 = vector.load %arg3[%c0_7, %c0_8] : memref<1x32xf32, #tpu.memory_space<vmem>>, vector<1x32xf32>
    %21 = vector.broadcast %20 : vector<1x32xf32> to vector<16x32xf32>
    %22 = arith.mulf %19, %21 : vector<16x32xf32>
    %c0_9 = arith.constant 0 : index
    %c0_10 = arith.constant 0 : index
    %23 = vector.load %arg4[%c0_9, %c0_10] : memref<1x32xf32, #tpu.memory_space<vmem>>, vector<1x32xf32>
    %24 = vector.broadcast %23 : vector<1x32xf32> to vector<16x32xf32>
    %25 = arith.addf %22, %24 : vector<16x32xf32>
    %c0_11 = arith.constant 0 : index
    %c0_12 = arith.constant 0 : index
    %26 = vector.load %arg5[%c0_11, %c0_12] : memref<16x32xf32, #tpu.memory_space<vmem>>, vector<16x32xf32>
    tpu.vector_store %arg5[%c0_11, %c0_12], %25 {strides = array<i32>} : memref<16x32xf32, #tpu.memory_space<vmem>>, vector<16x32xf32>,
    return
  }
  func.func @transform_0(%arg0: i32) -> (i32, i32) {
    %c0_i32 = arith.constant 0 : i32
    %c0_i32_0 = arith.constant 0 : i32
    return %arg0, %c0_i32 : i32, i32
  }
  func.func @transform_1(%arg0: i32) -> (i32, i32) {
    %c0_i32 = arith.constant 0 : i32
    %c0_i32_0 = arith.constant 0 : i32
    return %arg0, %c0_i32 : i32, i32
  }
  func.func @transform_2(%arg0: i32) -> (i32, i32) {
    %c0_i32 = arith.constant 0 : i32
    %c0_i32_0 = arith.constant 0 : i32
    %c0_i32_1 = arith.constant 0 : i32
    return %c0_i32, %c0_i32_0 : i32, i32
  }
  func.func @transform_3(%arg0: i32) -> (i32, i32) {
    %c0_i32 = arith.constant 0 : i32
    %c0_i32_0 = arith.constant 0 : i32
    %c0_i32_1 = arith.constant 0 : i32
    return %c0_i32, %c0_i32_0 : i32, i32
  }
  func.func @transform_4(%arg0: i32) -> (i32, i32) {
    %c0_i32 = arith.constant 0 : i32
    %c0_i32_0 = arith.constant 0 : i32
    return %arg0, %c0_i32 : i32, i32
  }
}

</mosaic_0001>

<bundles_post_ra>
// kernel: tpu_custom_call.1
= control target key start
LH: loop header
LB: loop body
LE: loop exit
PB: predicated region body
PF: predicated region fallthrough
CT: control target
= control target key end

     0   :  { %9 = vsyncpa [#allocation3], 0  ;;  %s306_s0 = inlined_call_operand.hbm [shape: f32[16,32], index: 0, kind: input, shape index: {}]   ;;  %s307_s1 = inlined_call_operand.hbm [shape: f32[16,32], index: 1, kind: input, shape index: {}]   ;;  %s308_s2 = inlined_call_operand.vmem [shape: f32[1,32], index: 2, kind: input, shape index: {}]   ;;  %s309_s3 = inlined_call_operand.vmem [shape: f32[1,32], index: 3, kind: input, shape index: {}]   ;;  %s310_s4 = inlined_call_operand.hbm [shape: f32[16,32], index: 4, kind: output, shape index: {}]  }
   0x1   :  { %10 = vsyncpa [#allocation6], 0 }
   0x2   :  { %11 = vsyncpa [#allocation4], 0  ;;  %s219_s15 = smov [#allocation2]   ;;  %s147_s19 = scalar_lea.hbm %s306_s0, 256 }
   0x3   :  { %s17_s16 = sshll.u32 %s219_s15, 4  ;;  %p148_p0 = scmp.ne.s32.totalorder %s306_s0, %s147_s19  ;;  %s18_s16 = int_to_ptr.vmem [resolvable:$true] %s17_s16 }
   0x4   :  { %p151_p1 = scmp.lt.u32.totalorder %s147_s19, %s306_s0 }
   0x6   :  { %p153_p2 = pnand %p151_p1, %p148_p0 }
   0x8   :  { %156 = shalt.err (!%p153_p2)
}
   0x9   :  { %s157_s24 = scalar_lea.vmem %s18_s16, 256  ;;  %p162_p4 = scmp.lt.s32.totalorder %s18_s16, %s18_s16 }
   0xa   :  { %p158_p3 = scmp.ne.s32.totalorder %s18_s16, %s157_s24  ;;  %p163_p5 = scmp.lt.s32.totalorder %s157_s24, %s157_s24 }
   0xc   :  { %p164_p6 = por %p163_p5, %p162_p4 }
   0xe   :  { %p165_p7 = pnand %p164_p6, %p158_p3 }
  0x10   :  { %168 = shalt.err (!%p165_p7)
}
  0x11   :  { %s220_s25 = smov 128   ;;  %s221_s26 = smov 8  }
  0x12   :  { %23 = dma.hbm_to_vmem [thread:$0]  %s306_s0, 256, %s18_s16, [#allocation3], %s220_s25, %s220_s25, %s221_s26  }
  0x13   :  { %s222_s29 = smov [#allocation5]   ;;  %s169_s7 = scalar_lea.hbm %s307_s1, 256 }
  0x14   :  { %s29_s30 = sshll.u32 %s222_s29, 4  ;;  %p170_p8 = scmp.ne.s32.totalorder %s307_s1, %s169_s7  ;;  %s30_s30 = int_to_ptr.vmem [resolvable:$true] %s29_s30 }
  0x15   :  { %p173_p9 = scmp.lt.u32.totalorder %s169_s7, %s307_s1 }
  0x17   :  { %p175_p10 = pnand %p173_p9, %p170_p8 }
  0x19   :  { %178 = shalt.err (!%p175_p10)
}
  0x1a   :  { %s179_s12 = scalar_lea.vmem %s30_s30, 256  ;;  %p184_p12 = scmp.lt.s32.totalorder %s30_s30, %s30_s30 }
  0x1b   :  { %p180_p11 = scmp.ne.s32.totalorder %s30_s30, %s179_s12  ;;  %p185_p13 = scmp.lt.s32.totalorder %s179_s12, %s179_s12 }
  0x1d   :  { %p186_p0 = por %p185_p13, %p184_p12 }
  0x1f   :  { %p187_p1 = pnand %p186_p0, %p180_p11 }
  0x21   :  { %190 = shalt.err (!%p187_p1)
}
  0x22   :  { %35 = dma.hbm_to_vmem [thread:$0]  %s307_s1, 256, %s30_s30, [#allocation6], %s220_s25, %s220_s25, %s221_s26  }
  0x23   :  { %213 = dma.done.wait [#allocation3], 256  }
  0x24   :  { %214 = vsyncadd [#allocation3], 4294967040 }
  0x25   :  { %215 = dma.done.wait [#allocation6], 256  }
  0x26   :  { %216 = vsyncadd [#allocation6], 4294967040  ;;  %v46_v0 = vld [vmem:[#allocation2] sm:$0xff]  ;;  %v48_v1 = vld [vmem:[#allocation5] sm:$0xff]  ;;  %vm52_vm0 = vcmask 261120   ;;  %s223_s17 = smov [#allocation7]  }
  0x27   :  { %v47_v2 = vld [vmem:[#allocation2 + $0x8] sm:$0xff]  ;;  %v50_v3 = vadd.f32 %v48_v1, %v46_v0  ;;  %v49_v4 = vld [vmem:[#allocation5 + $0x8] sm:$0xff]  ;;  %v132_v35 = vld [vmem:[%s308_s2] ss:$0 sm:$0xff]  ;;  %s119_s18 = sshll.u32 %s223_s17, 4  ;;  %s120_s18 = int_to_ptr.vmem [resolvable:$true] %s119_s18 }
  0x28   :  { %v51_v5 = vadd.f32 %v49_v4, %v47_v2  ;;  %v133_v37 = vld [vmem:[%s309_s3] ss:$0 sm:$0xff]  ;;  %s191_s19 = scalar_lea.vmem %s120_s18, 256  ;;  %p196_p3 = scmp.lt.s32.totalorder %s120_s18, %s120_s18 }
  0x29   :  { %v53_v6 = vsel %vm52_vm0, %v50_v3, 0.0  ;;  %p192_p2 = scmp.ne.s32.totalorder %s120_s18, %s191_s19  ;;  %p197_p4 = scmp.lt.s32.totalorder %s191_s19, %s191_s19 }
  0x2a   :  { %54 = vadd.xlane.f32.xlu0 %v53_v6  ;;  %v56_v7 = vsel %vm52_vm0, %v51_v5, 0.0 }
  0x2b   :  { %p198_p5 = por %p197_p4, %p196_p3 }
  0x2d   :  { %p199_p6 = pnand %p198_p5, %p192_p2 }
  0x2e   :  { %57 = vadd.xlane.f32.xlu0 %v56_v7 }
  0xb7   :  { %v55_v8 = vpop.xlane.xlu0 %54 }
  0xb8   :  { %v60_v9 = vmul.f32 0.03125, %v55_v8 }
  0xba   :  { %v62_v10 = vsub.f32 %v50_v3, %v60_v9 }
  0xbb   :  { %v58_v11 = vpop.xlane.xlu0 %57 }
  0xbc   :  { %v61_v12 = vmul.f32 0.03125, %v58_v11  ;;  %v64_v13 = vmul.f32 %v62_v10, %v62_v10 }
  0xbe   :  { %v63_v14 = vsub.f32 %v51_v5, %v61_v12  ;;  %v66_v15 = vsel %vm52_vm0, %v64_v13, 0.0 }
  0xbf   :  { %67 = vadd.xlane.f32.xlu1 %v66_v15 }
  0xc0   :  { %v65_v16 = vmul.f32 %v63_v14, %v63_v14 }
  0xc2   :  { %v69_v17 = vsel %vm52_vm0, %v65_v16, 0.0 }
  0xc3   :  { %70 = vadd.xlane.f32.xlu1 %v69_v17 }
 0x14c   :  { %v68_v18 = vpop.xlane.xlu1 %67 }
 0x14d   :  { %v72_v19 = vmul.f32 0.032258064, %v68_v18 }
 0x14f   :  { %139 = vrsqrt.f32 %v72_v19  ;;  %vm76_vm1 = vcmp.eq.f32.partialorder %v72_v19, inf  ;;  %v79_v24 = vand.u32 2147483648, %v72_v19  ;;  %vm78_vm2 = vcmp.eq.f32.partialorder %v72_v19, 0.0 }
 0x150   :  { %v71_v20 = vpop.xlane.xlu1 %70 }
 0x151   :  { %v73_v21 = vmul.f32 0.032258064, %v71_v20 }
 0x153   :  { %141 = vrsqrt.f32 %v73_v21  ;;  %vm83_vm3 = vcmp.eq.f32.partialorder %v73_v21, inf  ;;  %v86_v30 = vand.u32 2147483648, %v73_v21  ;;  %vm85_vm4 = vcmp.eq.f32.partialorder %v73_v21, 0.0 }
 0x159   :  { %v140_v22 = vpop.eup %139 }
 0x15a   :  { %v75_v23 = vmul.f32 %v140_v22, %v72_v19 }
 0x15c   :  { %v77_v25 = vsel %vm76_vm1, %v72_v19, %v75_v23 }
 0x15d   :  { %v142_v26 = vpop.eup %141  ;;  %v80_v27 = vsel %vm78_vm2, %v79_v24, %v77_v25 }
 0x15e   :  { %v88_v28 = vadd.f32 1e-06, %v80_v27  ;;  %v82_v29 = vmul.f32 %v142_v26, %v73_v21 }
 0x160   :  { %143 = vrcp.f32 %v88_v28  ;;  %v84_v31 = vsel %vm83_vm3, %v73_v21, %v82_v29 }
 0x161   :  { %v87_v32 = vsel %vm85_vm4, %v86_v30, %v84_v31 }
 0x162   :  { %v89_v33 = vadd.f32 1e-06, %v87_v32 }
 0x164   :  { %145 = vrcp.f32 %v89_v33 }
 0x16a   :  { %v144_v34 = vpop.eup %143 }
 0x16b   :  { %v92_v36 = vmul.f32 %v144_v34, %v62_v10 }
 0x16d   :  { %v101_v38 = vmul.f32 %v132_v35, %v92_v36 }
 0x16e   :  { %v146_v39 = vpop.eup %145 }
 0x16f   :  { %v93_v40 = vmul.f32 %v146_v39, %v63_v14  ;;  %v110_v41 = vadd.f32 %v133_v37, %v101_v38 }
 0x171   :  { %v102_v42 = vmul.f32 %v132_v35, %v93_v40  ;;  %112 = vst.msk [vmem:[#allocation7] sm:$0xff] %vm52_vm0, %v110_v41 }
 0x173   :  { %v111_v43 = vadd.f32 %v133_v37, %v102_v42 }
 0x175   :  { %113 = vst.msk [vmem:[#allocation7 + $0x8] sm:$0xff] %vm52_vm0, %v111_v43 }
 0x176   :  { %202 = shalt.err (!%p199_p6)
}
 0x177   :  { %s203_s20 = scalar_lea.hbm %s310_s4, 256 }
 0x178   :  { %p204_p7 = scmp.ne.s32.totalorder %s310_s4, %s203_s20  ;;  %p207_p8 = scmp.lt.u32.totalorder %s203_s20, %s310_s4 }
 0x17a   :  { %p209_p9 = pnand %p207_p8, %p204_p7 }
 0x17c   :  { %212 = shalt.err (!%p209_p9)
}
 0x17d   :  { %125 = dma.vmem_to_hbm [thread:$0]  %s120_s18, 256, %s310_s4, [#allocation4], %s220_s25, %s220_s25, %s221_s26  }
 0x17e   :  { %217 = dma.done.wait [#allocation4], 256  }
 0x17f   :  { %218 = vsyncadd [#allocation4], 4294967040 }
 0x180   :  { %129 = vsyncpa [#allocation3], 1 }
 0x181   :  { %130 = vsyncpa [#allocation6], 1 }
 0x182   :  { %131 = vsyncpa [#allocation4], 1 }

</bundles_post_ra>
